<compile_context>
chip_gen: v6e
topology: v6e:2x2x1
jax: 0.10.0
libtpu: 0.0.40
codegen_flags: <defaults>
</compile_context>

<pallas_src>
import jax
import jax.numpy as jnp
from jax.experimental import pallas as pl
from jax.experimental.pallas import tpu as pltpu


def _sage_simcor_kernel(adj_ref, feat_ref, self_ref, out_ref, acc_ref, deg_ref):
    # adj_ref : [tn, tk]  bf16 0/1 adjacency tile (dst rows x src cols)
    # feat_ref: [tk, Dp]  bf16 source-feature K-tile
    # self_ref: [tn, Dp]  bf16 dst self features (block index constant across k)
    # out_ref : [tn, Dp]  f32 output tile (written only on the last K step)
    # acc_ref : [tn, Dp]  f32 neighbor-sum accumulator (scratch)
    # deg_ref : [tn, 1]   f32 in-degree accumulator (scratch)
    k = pl.program_id(1)

    @pl.when(k == 0)
    def _init():
        acc_ref[...] = jnp.zeros_like(acc_ref)
        deg_ref[...] = jnp.zeros_like(deg_ref)

    adj = adj_ref[...]  # bf16 goes straight to the MXU; accumulate in f32.
    acc_ref[...] += jnp.dot(adj, feat_ref[...], preferred_element_type=jnp.float32)
    # In-degree contribution of this K chunk (accumulated across K tiles).
    deg_ref[...] += jnp.sum(adj.astype(jnp.float32), axis=-1, keepdims=True)

    @pl.when(k == pl.num_programs(1) - 1)
    def _finalize():
        deg = deg_ref[...]
        # DGL fn.mean over zero in-neighbors yields 0 (not NaN / inf).
        inv_deg = jnp.where(deg > 0.0, pl.reciprocal(deg, approx=True), 0.0)
        h_neigh = acc_ref[...] * inv_deg
        out_ref[...] = self_ref[...].astype(jnp.float32) + h_neigh


def sage_simcor_conv(adj, feat, *, tile_n=256, tile_k=512):
    """adj: [N_dst, N_src] 0/1 dense adjacency (selected edge type); feat: [N_src, D].

    Returns rst: [N_dst, D] = feat[:N_dst] + mean of in-neighbor features (f32 math,
    bf16 HBM streams), cast back to feat.dtype.
    """
    n_dst, n_src = adj.shape
    n_feat, d = feat.shape
    assert n_feat == n_src

    # TODO(synk): nn.Dropout(dropout) is a training-time stochastic op; identity here (eval).
    feat_b = adjb = None  # placeholders for clarity below
    feat_b = feat.astype(jnp.bfloat16)          # MXU-native input dtype
    adj_b = adj.astype(jnp.bfloat16)            # 0/1 values are exact in bf16
    self_b = feat_b[:n_dst]                     # non-block graph: h_self = feat[:N_dst]

    # Pad to lane-dense / tile-aligned shapes (zero padding is mathematically inert:
    # padded dst rows have deg 0 -> output 0, padded src cols/rows contribute nothing).
    d_pad = pl.cdiv(d, 128) * 128
    n_dst_p = pl.cdiv(n_dst, tile_n) * tile_n
    n_src_p = pl.cdiv(n_src, tile_k) * tile_k

    adj_p = jnp.pad(adj_b, ((0, n_dst_p - n_dst), (0, n_src_p - n_src)))
    feat_p = jnp.pad(feat_b, ((0, n_src_p - n_src), (0, d_pad - d)))
    self_p = jnp.pad(self_b, ((0, n_dst_p - n_dst), (0, d_pad - d)))

    grid = (n_dst_p // tile_n, n_src_p // tile_k)

    out_p = pl.pallas_call(
        _sage_simcor_kernel,
        out_shape=jax.ShapeDtypeStruct((n_dst_p, d_pad), jnp.float32),
        grid_spec=pltpu.PrefetchScalarGridSpec(
            num_scalar_prefetch=0,
            grid=grid,
            in_specs=[
                # adjacency tile for (dst tile i, K tile k)
                pl.BlockSpec((tile_n, tile_k), lambda i, k: (i, k)),
                # source-feature K-tile (full padded D extent)
                pl.BlockSpec((tile_k, d_pad), lambda i, k: (k, 0)),
                # dst self features: constant across k -> fetched once per dst tile
                pl.BlockSpec((tile_n, d_pad), lambda i, k: (i, 0)),
            ],
            out_specs=pl.BlockSpec((tile_n, d_pad), lambda i, k: (i, 0)),
            scratch_shapes=[
                pltpu.VMEM((tile_n, d_pad), jnp.float32),  # neighbor-sum accumulator
                pltpu.VMEM((tile_n, 1), jnp.float32),      # degree accumulator
            ],
        ),
        compiler_params=pltpu.CompilerParams(
            dimension_semantics=("parallel", "arbitrary"),
        ),
    )(adj_p, feat_p, self_p)

    return out_p[:n_dst, :d].astype(feat.dtype)


if __name__ == "__main__":
    key = jax.random.PRNGKey(0)
    k_adj, k_feat = jax.random.split(key)

    N = 256   # number of nodes (dst == src; not a DGL "block" graph)
    D = 64    # feature dim (padded to 128 lanes inside the wrapper)

    # Deterministic random graph (edge-type `mode` subgraph) as a dense 0/1 adjacency.
    adj = (jax.random.uniform(k_adj, (N, N)) < 0.05).astype(jnp.float32)
    feat = jax.random.normal(k_feat, (N, D), dtype=jnp.float32)

    # Small tiles so the 2x2 grid exercises both the parallel dst axis and the
    # K-reduction accumulator path; raise to (256, 512+) for real graph sizes.
    out = sage_simcor_conv(adj, feat, tile_n=128, tile_k=128)
    out = jax.block_until_ready(out)

    # Reference with the same bf16 input rounding (adj 0/1 is exact in bf16).
    feat_c = feat.astype(jnp.bfloat16).astype(jnp.float32)
    deg = jnp.sum(adj, axis=-1, keepdims=True)
    inv = jnp.where(deg > 0, 1.0 / deg, 0.0)
    ref = feat_c[:N] + (adj @ feat_c) * inv

    assert out.shape == (N, D)
    assert jnp.allclose(out, ref, atol=1e-2, rtol=1e-2), "mismatch vs reference"

    print("KERNEL_OK")
</pallas_src>

<mosaic_0001>
module attributes {stable_mosaic.version = 11 : i64} {
  func.func @_sage_simcor_kernel(%arg0: i32, %arg1: i32, %arg2: memref<128x128xbf16, #tpu.memory_space<vmem>>, %arg3: memref<128x128xbf16, #tpu.memory_space<vmem>>, %arg4: memref<128x128xbf16, #tpu.memory_space<vmem>>, %arg5: memref<128x128xf32, #tpu.memory_space<vmem>>, %arg6: memref<128x128xf32, #tpu.memory_space<vmem>>, %arg7: memref<128x1xf32, #tpu.memory_space<vmem>>) attributes {dimension_semantics = [#tpu.dimension_semantics<parallel>, #tpu.dimension_semantics<arbitrary>], iteration_bounds = array<i64: 2, 2>, scalar_prefetch = 0 : i64, scratch_operands = 2 : i64, tpu.core_type = #tpu.core_type<tc>, window_params = [{transform_indices = @transform_0, window_bounds = array<i64: 128, 128>}, {transform_indices = @transform_1, window_bounds = array<i64: 128, 128>}, {transform_indices = @transform_2, window_bounds = array<i64: 128, 128>}, {transform_indices = @transform_3, window_bounds = array<i64: 128, 128>}]} {
    %c0_i32 = arith.constant 0 : i32
    %0 = arith.cmpi eq, %arg1, %c0_i32 : i32
    %1 = arith.extui %0 : i1 to i32
    %c0_i32_0 = arith.constant 0 : i32
    %2 = arith.cmpi ne, %1, %c0_i32_0 : i32
    scf.if %2 {
      %cst_14 = arith.constant 0.000000e+00 : f32
      %18 = vector.broadcast %cst_14 : f32 to vector<128x128xf32>
      %c0_15 = arith.constant 0 : index
      %c0_16 = arith.constant 0 : index
      %19 = vector.load %arg6[%c0_15, %c0_16] : memref<128x128xf32, #tpu.memory_space<vmem>>, vector<128x128xf32>
      tpu.vector_store %arg6[%c0_15, %c0_16], %18 {strides = array<i32>} : memref<128x128xf32, #tpu.memory_space<vmem>>, vector<128x128xf32>,
      %cst_17 = arith.constant 0.000000e+00 : f32
      %20 = vector.broadcast %cst_17 : f32 to vector<128x1xf32>
      %c0_18 = arith.constant 0 : index
      %c0_19 = arith.constant 0 : index
      %21 = vector.load %arg7[%c0_18, %c0_19] : memref<128x1xf32, #tpu.memory_space<vmem>>, vector<128x1xf32>
      tpu.vector_store %arg7[%c0_18, %c0_19], %20 {strides = array<i32>} : memref<128x1xf32, #tpu.memory_space<vmem>>, vector<128x1xf32>,
    } else {
    }
    %c0 = arith.constant 0 : index
    %c0_1 = arith.constant 0 : index
    %3 = vector.load %arg2[%c0, %c0_1] : memref<128x128xbf16, #tpu.memory_space<vmem>>, vector<128x128xbf16>
    %c0_2 = arith.constant 0 : index
    %c0_3 = arith.constant 0 : index
    %4 = vector.load %arg6[%c0_2, %c0_3] : memref<128x128xf32, #tpu.memory_space<vmem>>, vector<128x128xf32>
    %c0_4 = arith.constant 0 : index
    %c0_5 = arith.constant 0 : index
    %5 = vector.load %arg3[%c0_4, %c0_5] : memref<128x128xbf16, #tpu.memory_space<vmem>>, vector<128x128xbf16>
    %cst = arith.constant dense<0.000000e+00> : vector<128x128xf32>
    %6 = tpu.matmul %3, %5, %cst {dimension_numbers = #tpu.dot_dimension_numbers<[1], [0], [0], [1], [0, 0, 1, 1], [], []>} : vector<128x128xbf16>, vector<128x128xbf16>, vector<128x128xf32> -> vector<128x128xf32>
    %7 = arith.addf %4, %6 : vector<128x128xf32>
    %c0_6 = arith.constant 0 : index
    %c0_7 = arith.constant 0 : index
    %8 = vector.load %arg6[%c0_6, %c0_7] : memref<128x128xf32, #tpu.memory_space<vmem>>, vector<128x128xf32>
    tpu.vector_store %arg6[%c0_6, %c0_7], %7 {strides = array<i32>} : memref<128x128xf32, #tpu.memory_space<vmem>>, vector<128x128xf32>,
    %c0_8 = arith.constant 0 : index
    %c0_9 = arith.constant 0 : index
    %9 = vector.load %arg7[%c0_8, %c0_9] : memref<128x1xf32, #tpu.memory_space<vmem>>, vector<128x1xf32>
    %10 = arith.extf %3 : vector<128x128xbf16> to vector<128x128xf32>
    %cst_10 = arith.constant dense<0.000000e+00> : vector<128xf32>
    %11 = vector.multi_reduction <add>, %10, %cst_10 [1] : vector<128x128xf32> to vector<128xf32>
    %12 = vector.shape_cast %11 : vector<128xf32> to vector<128x1xf32>
    %13 = arith.addf %9, %12 : vector<128x1xf32>
    %c0_11 = arith.constant 0 : index
    %c0_12 = arith.constant 0 : index
    %14 = vector.load %arg7[%c0_11, %c0_12] : memref<128x1xf32, #tpu.memory_space<vmem>>, vector<128x1xf32>
    tpu.vector_store %arg7[%c0_11, %c0_12], %13 {strides = array<i32>} : memref<128x1xf32, #tpu.memory_space<vmem>>, vector<128x1xf32>,
    %c1_i32 = arith.constant 1 : i32
    %15 = arith.cmpi eq, %arg1, %c1_i32 : i32
    %16 = arith.extui %15 : i1 to i32
    %c0_i32_13 = arith.constant 0 : i32
    %17 = arith.cmpi ne, %16, %c0_i32_13 : i32
    scf.if %17 {
      %c0_14 = arith.constant 0 : index
      %c0_15 = arith.constant 0 : index
      %18 = vector.load %arg7[%c0_14, %c0_15] : memref<128x1xf32, #tpu.memory_space<vmem>>, vector<128x1xf32>
      %cst_16 = arith.constant 0.000000e+00 : f32
      %19 = vector.broadcast %cst_16 : f32 to vector<128x1xf32>
      %20 = arith.cmpf ogt, %18, %19 : vector<128x1xf32>
      %21 = tpu.reciprocal %18 {approx = true} : vector<128x1xf32> -> vector<128x1xf32>
      %cst_17 = arith.constant 0.000000e+00 : f32
      %22 = vector.broadcast %cst_17 : f32 to vector<128x1xf32>
      %23 = arith.select %20, %21, %22 : vector<128x1xi1>, vector<128x1xf32>
      %c0_18 = arith.constant 0 : index
      %c0_19 = arith.constant 0 : index
      %24 = vector.load %arg6[%c0_18, %c0_19] : memref<128x128xf32, #tpu.memory_space<vmem>>, vector<128x128xf32>
      %25 = vector.broadcast %23 : vector<128x1xf32> to vector<128x128xf32>
      %26 = arith.mulf %24, %25 : vector<128x128xf32>
      %c0_20 = arith.constant 0 : index
      %c0_21 = arith.constant 0 : index
      %27 = vector.load %arg4[%c0_20, %c0_21] : memref<128x128xbf16, #tpu.memory_space<vmem>>, vector<128x128xbf16>
      %28 = arith.extf %27 : vector<128x128xbf16> to vector<128x128xf32>
      %29 = arith.addf %28, %26 : vector<128x128xf32>
      %c0_22 = arith.constant 0 : index
      %c0_23 = arith.constant 0 : index
      %30 = vector.load %arg5[%c0_22, %c0_23] : memref<128x128xf32, #tpu.memory_space<vmem>>, vector<128x128xf32>
      tpu.vector_store %arg5[%c0_22, %c0_23], %29 {strides = array<i32>} : memref<128x128xf32, #tpu.memory_space<vmem>>, vector<128x128xf32>,
    } else {
    }
    return
  }
  func.func @transform_0(%arg0: i32, %arg1: i32) -> (i32, i32) {
    %c0_i32 = arith.constant 0 : i32
    return %arg0, %arg1 : i32, i32
  }
  func.func @transform_1(%arg0: i32, %arg1: i32) -> (i32, i32) {
    %c0_i32 = arith.constant 0 : i32
    %c0_i32_0 = arith.constant 0 : i32
    return %arg1, %c0_i32 : i32, i32
  }
  func.func @transform_2(%arg0: i32, %arg1: i32) -> (i32, i32) {
    %c0_i32 = arith.constant 0 : i32
    %c0_i32_0 = arith.constant 0 : i32
    return %arg0, %c0_i32 : i32, i32
  }
  func.func @transform_3(%arg0: i32, %arg1: i32) -> (i32, i32) {
    %c0_i32 = arith.constant 0 : i32
    %c0_i32_0 = arith.constant 0 : i32
    return %arg0, %c0_i32 : i32, i32
  }
}

</mosaic_0001>

<bundles_post_ra>
// kernel: tpu_custom_call.1
= control target key start
LH: loop header
LB: loop body
LE: loop exit
PB: predicated region body
PF: predicated region fallthrough
CT: control target
= control target key end

     0   :  { %s2120_s0 = inlined_call_operand.hbm [shape: bf16[256,256], index: 0, kind: input, shape index: {}]   ;;  %s2121_s1 = inlined_call_operand.hbm [shape: bf16[256,128], index: 1, kind: input, shape index: {}]   ;;  %s2122_s2 = inlined_call_operand.hbm [shape: bf16[256,128], index: 2, kind: input, shape index: {}]   ;;  %s2123_s3 = inlined_call_operand.hbm [shape: f32[256,128], index: 3, kind: output, shape index: {}]  }
   0x1   :  { %2137 = sst [smem:[#allocation23_spill]] %s2120_s0 }
   0x2   :  { %2138 = sst [smem:[#allocation24_spill]] %s2121_s1 }
   0x3   :  { %2139 = sst [smem:[#allocation25_spill]] %s2123_s3 }
   0x4   :  { %8 = vsyncpa [#allocation5], 0 }
   0x5   :  { %10 = vsyncpa [#allocation5 + $0x1], 0 }
   0x6   :  { %11 = vsyncpa [#allocation8], 0 }
   0x7   :  { %13 = vsyncpa [#allocation8 + $0x1], 0 }
   0x8   :  { %14 = vsyncpa [#allocation6], 0 }
   0x9   :  { %16 = vsyncpa [#allocation6 + $0x1], 0  ;;  %s1700_s12 = smov 0   ;;  %s1702_s13 = smov 0  }
   0xa   :  { %s1704_s14 = smov 0   ;;  %s1706_s15 = smov 0  }
   0xb   :  { %s1708_s16 = smov 0   ;;  %s1710_s17 = smov 0  }
   0xc   :  { %s1712_s18 = smov 0   ;;  %s1714_s19 = smov 0  }
   0xd   :  { %s1716_s20 = smov 0   ;;  %s1718_s21 = smov 0  }
   0xe   :  { %s1720_s22 = smov 0   ;;  %s1722_s23 = smov 0  }
   0xf   :  { %s1724_s24 = smov 0   ;;  %s1726_s25 = smov 0  }
  0x10 LB: > { %2140 = sst [smem:[#allocation15_spill]] %s1647_s20  ;;  %s1771_s26 = sadd.s32 4294967295, %s1667_s25   ;;  %s1667_s25 = sphi %s1726_s25, %s22_s25   ;;  %s1663_s24 = sphi %s1724_s24, %s2179_s24   ;;  %s1659_s23 = sphi %s1722_s23, %s2178_s23   ;;  %s1655_s22 = sphi %s1720_s22, %s2177_s22   ;;  %s1651_s21 = sphi %s1718_s21, %s2176_s21   ;;  %s1647_s20 = sphi %s1716_s20, %s2175_s20   ;;  %s1643_s19 = sphi %s1714_s19, %s2187_s19   ;;  %s1639_s18 = sphi %s1712_s18, %s2186_s18   ;;  %s1635_s17 = sphi %s1710_s17, %s2185_s17   ;;  %s1631_s16 = sphi %s1708_s16, %s2184_s16   ;;  %s1627_s15 = sphi %s1706_s15, %s2183_s15   ;;  %s1623_s14 = sphi %s1704_s14, %s2182_s14   ;;  %s1619_s13 = sphi %s1702_s13, %s2181_s13   ;;  %s1615_s12 = sphi %s1700_s12, %s2180_s12  }
  0x11   : > { %2141 = sst [smem:[#allocation16_spill]] %s1655_s22  ;;  %s31_s27 = sadd.s32 1, %s1659_s23 }
  0x12   : > { %2142 = sst [smem:[#allocation17_spill]] %s1659_s23  ;;  %p32_p0 = scmp.ge.s32.totalorder %s31_s27, 2 }
  0x13   : > { %2143 = sst [smem:[#allocation18_spill]] %s1663_s24  ;;  %s34_s28 = sadd.s32 1, %s1663_s24 }
  0x14   : > { %p2134_p1 = scmp.eq.s32.totalorder %s1667_s25, 0  ;;  %p2128_p2 = scmp.eq.s32.totalorder %s1771_s26, 0 }
  0x15   : > { %s2189_s27 = smov (%p32_p0, %s31_s27), 0  ;;  %s2191_s28 = smov (!%p32_p0, %s34_s28), %s1663_s24 }
  0x16   : > { %2144 = sst [smem:[#allocation19_spill]] %s2189_s27  ;;  %s39_s29 = ssub.s32 %s1659_s23, %s2189_s27 }
  0x17   : > { %s69_s30 = sadd.s32 1, %s1635_s17  ;;  %p36_p3 = scmp.ge.s32.totalorder %s2191_s28, 2 }
  0x18   : > { %p67_p4 = scmp.eq.s32.totalorder %s39_s29, 0  ;;  %p76_p5 = scmp.ne.s32.totalorder %s1635_s17, %s1631_s16 }
  0x19   : > { %p82_p6 = scmp.ne.s32.totalorder %s1631_s16, %s1627_s15  ;;  %s2193_s28 = smov (%p36_p3, %s2191_s28), 0 }
  0x1a   : > { %2145 = sst [smem:[#allocation20_spill]] %s2193_s28  ;;  %s1794_s5 = ssub.s32 %s1663_s24, %s2193_s28 }
  0x1b   : > { %s1790_s4 = scalar_select %p67_p4, %s1635_s17, %s69_s30  }
  0x1c   : > { %p1798_p7 = por %p76_p5, %p2134_p1  ;;  %s40_s7 = sor.u32 %s39_s29, %s1794_s5 }
  0x1d   : > { %2146 = sst [smem:[#allocation21_spill]] %s1790_s4  ;;  %p1805_p8 = por %p82_p6, %p2128_p2 }
  0x1e   : > { %p1809_p9 = scmp.eq.s32.totalorder %s40_s7, 0  ;;  %p2127_p11 = scmp.lt.s32.totalorder %s1667_s25, 4 }
  0x1f   : > { %s181_s10 = sand.u32 1, %s1667_s25   ;;  %s183_s11 = sand.u32 1, %s1635_s17  }
  0x20   : > { %s1089_s15 = sshll.u32 %s183_s11, 6  ;;  %s1124_s30 = sshll.u32 %s1659_s23, 10 }
  0x21   : > { %s2150_s1 = sld [smem:[#allocation24_spill]]  ;;  %s185_s29 = scalar_lea.vmem [#allocation7], %s1089_s15 }
  0x22   : > { %s192_s3 = sshll.u32 %s185_s29, 4  ;;  %p1825_p12 = pnand %p2127_p11, %p1798_p7  ;;  %s193_s3 = int_to_ptr.vmem [resolvable:$true] %s192_s3 }
  0x23   : > { %p1095_p13 = scmp.ge.s32.totalorder %s1667_s25, 1  ;;  %p221_p0 = scmp.lt.s32.totalorder %s1667_s25, 5 }
  0x24   : > { %s1831_s22 = scalar_lea.sflag [#allocation8], %s181_s10  ;;  %p1433_p3 = pneg %p1825_p12 }
  0x25   : > { %s1444_s11 = scalar_lea.vmem %s193_s3, 1024  ;;  %s1669_s27 = smov [#allocation7]  }
  0x26   : > { %p1445_p4 = scmp.ne.s32.totalorder %s193_s3, %s1444_s11  ;;  %s1449_s28 = sshll.u32 %s1669_s27, 4  ;;  %s1450_s28 = int_to_ptr.vmem [resolvable:$false] %s1449_s28 }
  0x27   : > { %s191_s4 = scalar_lea.hbm %s2150_s1, %s1124_s30  ;;  %s1451_s6 = scalar_lea.vmem %s1450_s28, 2048 }
  0x28   : > { %p1447_p5 = pnand %p1445_p4, %p1433_p3  ;;  %p1452_p10 = scmp.lt.s32.totalorder %s193_s3, %s1450_s28 }
  0x29   : > { %p1453_p7 = scmp.lt.s32.totalorder %s1451_s6, %s1444_s11 }
  0x2a   : > { %p1448_p6 = pneg %p1447_p5 }
  0x2b   : > { %p1454_p11 = por %p1453_p7, %p1452_p10 }
  0x2d   : > { %p1455_p2 = pnand %p1454_p11, %p1448_p6 }
  0x2f   : > { %1458 = shalt.err (!%p1455_p2)
}
  0x30   : > { %s2129_s15 = smov 64   ;;  %s2131_s10 = smov 4  }
  0x31   : > { %1244 = dma.hbm_to_vmem [thread:$0]  (!%p1825_p12), %s191_s4, 1024, %s193_s3, %s1831_s22, %s2129_s15, %s2129_s15, %s2131_s10  }
  0x32   : > { %p1845_p2 = pnand %p1095_p13, %p221_p0  ;;  %s43_s29 = sadd.s32 1, %s1647_s20 }
  0x33   : > { %p50_p10 = scmp.ne.s32.totalorder %s1647_s20, %s1643_s19  ;;  %p56_p3 = scmp.ne.s32.totalorder %s1643_s19, %s1639_s18 }
  0x34   : > { %s1855_s11 = scalar_select %p1809_p9, %s1647_s20, %s43_s29  }
  0x35   : > { %p52_p11 = por %p2134_p1, %p50_p10  ;;  %s158_s7 = sand.u32 1, %s1647_s20  }
  0x36   : > { %2153 = sst [smem:[#allocation22_spill]] %s1855_s11  ;;  %s1123_s27 = sshll.u32 %s1663_s24, 5 }
  0x37   : > { %p2154_p4 = scmp.eq.s32.totalorder %s1771_s26, 0  ;;  %s1085_s4 = sshll.u32 %s158_s7, 6 }
  0x38   : > { %s168_s28 = sadd.s32 %s1659_s23, %s1123_s27  ;;  %s2156_s0 = sld [smem:[#allocation23_spill]] }
  0x39   : > { %p1865_p5 = por %p2154_p4, %p56_p3  ;;  %s1088_s6 = sshll.u32 %s168_s28, 6 }
  0x3a   : > { %s162_s9 = scalar_lea.vmem [#allocation4], %s1085_s4  ;;  %p2157_p9 = scmp.lt.s32.totalorder %s1667_s25, 4 }
  0x3b   : > { %s171_s29 = sshll.u32 %s162_s9, 4  ;;  %s159_s11 = scalar_lea.sflag [#allocation5], %s158_s7  ;;  %s172_s29 = int_to_ptr.vmem [resolvable:$true] %s171_s29 }
  0x3c   : > { %p1875_p12 = pnand %p2157_p9, %p52_p11  ;;  %s1472_s20 = scalar_lea.vmem %s172_s29, 1024 }
  0x3d   : > { %p1473_p0 = scmp.ne.s32.totalorder %s172_s29, %s1472_s20  ;;  %s1672_s27 = smov [#allocation4]  }
  0x3e   : > { %s170_s1 = scalar_lea.hbm %s2156_s0, %s1088_s6  ;;  %p1461_p13 = pneg %p1875_p12 }
  0x3f   : > { %s1477_s28 = sshll.u32 %s1672_s27, 4  ;;  %s1478_s28 = int_to_ptr.vmem [resolvable:$false] %s1477_s28 }
  0x40   : > { %p1475_p6 = pnand %p1473_p0, %p1461_p13  ;;  %s1479_s15 = scalar_lea.vmem %s1478_s28, 2048 }
  0x41   : > { %p1480_p10 = scmp.lt.s32.totalorder %s172_s29, %s1478_s28  ;;  %p1481_p3 = scmp.lt.s32.totalorder %s1479_s15, %s1472_s20 }
  0x42   : > { %p1476_p7 = pneg %p1475_p6 }
  0x43   : > { %p1482_p4 = por %p1481_p3, %p1480_p10 }
  0x45   : > { %p1483_p1 = pnand %p1482_p4, %p1476_p7 }
  0x47   : > { %1486 = shalt.err (!%p1483_p1)
}
  0x48   : > { %s1673_s10 = smov 128   ;;  %s2159_s4 = smov 4  }
  0x49   : > { %s2160_s7 = smov 64   ;;  %s1082_s20 = sadd.s32 4294967294, %s1667_s25  }
  0x4a   : > { %1241 = dma.hbm_to_vmem [thread:$0]  (!%p1875_p12), %s170_s1, 1024, %s172_s29, %s159_s11, %s1673_s10, %s2160_s7, %s2159_s4  }
  0x4b   : > { %s95_s6 = sadd.s32 1, %s1623_s14  ;;  %p2161_p1 = scmp.eq.s32.totalorder %s1794_s5, 0 }
  0x4c   : > { %p102_p11 = scmp.ne.s32.totalorder %s1623_s14, %s1619_s13  ;;  %p108_p9 = scmp.ne.s32.totalorder %s1619_s13, %s1615_s12 }
  0x4d   : > { %s1890_s9 = scalar_select %p2161_p1, %s1623_s14, %s95_s6  }
  0x4e   : > { %p132_p13 = scmp.eq.s32.totalorder %s1771_s26, 3  ;;  %p138_p0 = scmp.eq.s32.totalorder %s1082_s20, 3 }
  0x4f   : > { %p2162_p6 = scmp.eq.s32.totalorder %s1667_s25, 0  ;;  %p2163_p10 = scmp.eq.s32.totalorder %s1771_s26, 0 }
  0x50   : > { %p1905_p4 = por %p132_p13, %p102_p11  ;;  %p1909_p12 = por %p138_p0, %p108_p9 }
  0x51   : > { %p104_p7 = por %p102_p11, %p2162_p6  ;;  %p1901_p3 = por %p108_p9, %p2163_p10 }
  0x52   : > { %s2166_s1 = scalar_select %p1909_p12, 1, 0 }
  0x53   : > { %s204_s5 = sand.u32 1, %s1623_s14   ;;  %s1125_s11 = sshll.u32 %s1663_s24, 10 }
  0x54   : > { %s1092_s29 = sshll.u32 %s204_s5, 6  ;;  %s212_s10 = scalar_lea.hbm %s2122_s2, %s1125_s11 }
  0x55   : > { %p2167_p1 = scmp.lt.s32.totalorder %s1667_s25, 4  ;;  %s206_s6 = scalar_lea.vmem [#allocation9], %s1092_s29 }
  0x56   : > { %s213_s0 = sshll.u32 %s206_s6, 4  ;;  %s1674_s5 = smov [#allocation9]   ;;  %s214_s0 = int_to_ptr.vmem [resolvable:$true] %s213_s0 }
  0x57   : > { %p1920_p6 = pnand %p2167_p1, %p104_p7  ;;  %s1500_s23 = scalar_lea.vmem %s214_s0, 1024 }
  0x58   : > { %p1501_p9 = scmp.ne.s32.totalorder %s214_s0, %s1500_s23  ;;  %s1505_s24 = sshll.u32 %s1674_s5, 4  ;;  %s1506_s24 = int_to_ptr.vmem [resolvable:$false] %s1505_s24 }
  0x59   : > { %p1489_p11 = pneg %p1920_p6  ;;  %s1507_s28 = scalar_lea.vmem %s1506_s24, 2048 }
  0x5a   : > { %p1508_p10 = scmp.lt.s32.totalorder %s214_s0, %s1506_s24  ;;  %p1509_p12 = scmp.lt.s32.totalorder %s1507_s28, %s1500_s23 }
  0x5b   : > { %p1503_p13 = pnand %p1501_p9, %p1489_p11 }
  0x5c   : > { %p1510_p7 = por %p1509_p12, %p1508_p10 }
  0x5d   : > { %p1504_p0 = pneg %p1503_p13 }
  0x5f   : > { %p1511_p1 = pnand %p1510_p7, %p1504_p0 }
  0x61   : > { %1514 = shalt.err (!%p1511_p1)
}
  0x62   : > { %1247 = dma.hbm_to_vmem [thread:$0]  (!%p1920_p6), %s212_s10, 1024, %s214_s0, %s1831_s22, %s2160_s7, %s2160_s7, %s2159_s4  }
  0x63   : > { %225 = sbr.rel (%p1845_p2) target bundleno = 579 (0x243), region = 32  ;;  %s227_s11 = sand.u32 (!%p1845_p2), 1, %s1643_s19  }
  0x64   : > { %s1096_s29 = sshll.u32 (!%p1845_p2), %s227_s11, 6  ;;  %s228_s15 = scalar_lea.sflag (!%p1845_p2), [#allocation5], %s227_s11 }
  0x65   : > { %s1935_s24 = scalar_lea.vmem (!%p1845_p2), [#allocation4], %s1096_s29 }
  0x68   : > { %1598 = dma.done.wait (%p1865_p5), %s228_s15, 1024  }
  0x69   : > { %1600 = vsyncadd (%p1865_p5), %s228_s15, 4294966272  ;;  %s236_s23 = sand.u32 1, %s1771_s26   ;;  %s238_s0 = sand.u32 1, %s1631_s16  }
  0x6a   : > { %s1097_s22 = sshll.u32 %s238_s0, 6  ;;  %s237_s30 = scalar_lea.sflag [#allocation8], %s236_s23 }
  0x6b   : > { %s1943_s4 = scalar_lea.vmem [#allocation7], %s1097_s22 }
  0x6c   : > { %1602 = dma.done.wait (%p1805_p8), %s237_s30, 1024  }
  0x6d   : > { %1604 = vsyncadd (%p1805_p8), %s237_s30, 4294966272  ;;  %s1950_s7 = sand.u32 1, %s1619_s13  }
  0x6e   : > { %s1098_s3 = sshll.u32 %s1950_s7, 6 }
  0x6f   : > { %s1953_s10 = scalar_lea.vmem [#allocation9], %s1098_s3 }
  0x70   : > { %1606 = dma.done.wait (%p1901_p3), %s237_s30, 1024  }
  0x71   : > { %1608 = vsyncadd (%p1901_p3), %s237_s30, 4294966272  ;;  %s1099_s26 = sshll.u32 %s1950_s7, 7  ;;  %p1100_p2 = scmp.ne.s32.totalorder %s1651_s21, 0 }
  0x72   : > { %s1960_s20 = scalar_lea.vmem [#allocation10], %s1099_s26 }
  0x73   : > { %290 = sbr.rel (%p1100_p2) target bundleno = 137 (0x89), region = 48 }
  0x78   : > { %vm307_vm0 = vcmask 7168   ;;  %v1675_v0 = vmov 0.0  }
  0x79   : > { %291 = vst [vmem:[#allocation2 + $0x30] sm:$0xff] %v1675_v0  ;;  %292 = vst [vmem:[#allocation2] sm:$0xff] %v1675_v0 }
  0x7a   : > { %293 = vst [vmem:[#allocation2 + $0x58] sm:$0xff] %v1675_v0  ;;  %294 = vst [vmem:[#allocation2 + $0x18] sm:$0xff] %v1675_v0 }
  0x7b   : > { %295 = vst [vmem:[#allocation2 + $0x50] sm:$0xff] %v1675_v0  ;;  %296 = vst [vmem:[#allocation2 + $0x68] sm:$0xff] %v1675_v0 }
  0x7c   : > { %297 = vst [vmem:[#allocation2 + $0x8] sm:$0xff] %v1675_v0  ;;  %298 = vst [vmem:[#allocation2 + $0x48] sm:$0xff] %v1675_v0 }
  0x7d   : > { %299 = vst [vmem:[#allocation2 + $0x40] sm:$0xff] %v1675_v0  ;;  %300 = vst [vmem:[#allocation2 + $0x20] sm:$0xff] %v1675_v0 }
  0x7e   : > { %301 = vst [vmem:[#allocation2 + $0x10] sm:$0xff] %v1675_v0  ;;  %302 = vst [vmem:[#allocation2 + $0x38] sm:$0xff] %v1675_v0 }
  0x7f   : > { %303 = vst [vmem:[#allocation2 + $0x60] sm:$0xff] %v1675_v0  ;;  %304 = vst [vmem:[#allocation2 + $0x70] sm:$0xff] %v1675_v0 }
  0x80   : > { %305 = vst [vmem:[#allocation2 + $0x78] sm:$0xff] %v1675_v0  ;;  %306 = vst [vmem:[#allocation2 + $0x28] sm:$0xff] %v1675_v0 }
  0x81   : > { %308 = vst.msk [vmem:[#allocation3] sm:$0xff] %vm307_vm0, %v1675_v0  ;;  %309 = vst.msk [vmem:[#allocation3 + $0x8] sm:$0xff] %vm307_vm0, %v1675_v0 }
  0x82   : > { %310 = vst.msk [vmem:[#allocation3 + $0x10] sm:$0xff] %vm307_vm0, %v1675_v0  ;;  %311 = vst.msk [vmem:[#allocation3 + $0x18] sm:$0xff] %vm307_vm0, %v1675_v0 }
  0x83   : > { %312 = vst.msk [vmem:[#allocation3 + $0x20] sm:$0xff] %vm307_vm0, %v1675_v0  ;;  %313 = vst.msk [vmem:[#allocation3 + $0x28] sm:$0xff] %vm307_vm0, %v1675_v0 }
  0x84   : > { %314 = vst.msk [vmem:[#allocation3 + $0x30] sm:$0xff] %vm307_vm0, %v1675_v0  ;;  %315 = vst.msk [vmem:[#allocation3 + $0x38] sm:$0xff] %vm307_vm0, %v1675_v0 }
  0x85   : > { %316 = vst.msk [vmem:[#allocation3 + $0x40] sm:$0xff] %vm307_vm0, %v1675_v0  ;;  %317 = vst.msk [vmem:[#allocation3 + $0x48] sm:$0xff] %vm307_vm0, %v1675_v0 }
  0x86   : > { %318 = vst.msk [vmem:[#allocation3 + $0x50] sm:$0xff] %vm307_vm0, %v1675_v0  ;;  %319 = vst.msk [vmem:[#allocation3 + $0x58] sm:$0xff] %vm307_vm0, %v1675_v0 }
  0x87   : > { %320 = vst.msk [vmem:[#allocation3 + $0x60] sm:$0xff] %vm307_vm0, %v1675_v0  ;;  %321 = vst.msk [vmem:[#allocation3 + $0x68] sm:$0xff] %vm307_vm0, %v1675_v0 }
  0x88   : > { %322 = vst.msk [vmem:[#allocation3 + $0x70] sm:$0xff] %vm307_vm0, %v1675_v0  ;;  %323 = vst.msk [vmem:[#allocation3 + $0x78] sm:$0xff] %vm307_vm0, %v1675_v0 }
  0x89 PF: > { %v1373_v1 = vld [vmem:[%s1943_s4 + $0x38] sm:$0xff]   ;;  %v1374_v2 = vld [vmem:[%s1943_s4 + $0x30] sm:$0xff]   ;;  %v1375_v3 = vld [vmem:[%s1943_s4 + $0x28] sm:$0xff]   ;;  %vm677_vm1 = vcmask 7168   ;;  %p1117_p8 = scmp.ne.s32.totalorder %s1651_s21, 1 }
  0x8a   : > { %1182 = vmatprep.subr.bf16.mxu0 %v1373_v1  ;;  %1214 = vmatprep.subr.bf16.mxu1 %v1373_v1  ;;  %v1376_v4 = vld [vmem:[%s1943_s4 + $0x20] sm:$0xff]   ;;  %v326_v7 = vld [vmem:[%s1935_s24 + $0x8] sm:$0xff]   ;;  %v1377_v10 = vld [vmem:[%s1943_s4 + $0x18] sm:$0xff]  }
  0x8b   : > { %1183 = vmatpush3.bf16.msra.mxu0 %v1373_v1  ;;  %1222 = vmatpush3.bf16.msra.mxu1 %v1373_v1  ;;  %v324_v5 = vld [vmem:[%s1935_s24] sm:$0xff]   ;;  %v615_v8 = vunpack.c.l.bf16 %v326_v7  ;;  %v616_v11 = vunpack.c.h.bf16 %v326_v7  ;;  %v1378_v13 = vld [vmem:[%s1943_s4 + $0x10] sm:$0xff]   ;;  %v1379_v17 = vld [vmem:[%s1943_s4 + $0x8] sm:$0xff]  }
  0x8c   : > { %1184 = vmatprep.subr.bf16.mxu0 %v1374_v2  ;;  %1215 = vmatprep.subr.bf16.mxu1 %v1374_v2  ;;  %v332_v6 = vld [vmem:[%s1935_s24 + $0x20] sm:$0xff]   ;;  %v613_v9 = vunpack.c.l.bf16 %v324_v5  ;;  %v614_v12 = vunpack.c.h.bf16 %v324_v5  ;;  %v328_v14 = vld [vmem:[%s1935_s24 + $0x10] sm:$0xff]   ;;  %v330_v18 = vld [vmem:[%s1935_s24 + $0x18] sm:$0xff]  }
  0x8d   : > { %1198 = vmatprep.mubr.bf16.mxu0 %v324_v5  ;;  %1206 = vmatprep.mubr.bf16.mxu1 %v332_v6  ;;  %v618_v15 = vunpack.c.h.bf16 %v328_v14  ;;  %v617_v16 = vunpack.c.l.bf16 %v328_v14  ;;  %v620_v19 = vunpack.c.h.bf16 %v330_v18  ;;  %v619_v20 = vunpack.c.l.bf16 %v330_v18  ;;  %v1380_v21 = vld [vmem:[%s1943_s4] sm:$0xff]   ;;  %v334_v24 = vld [vmem:[%s1935_s24 + $0x28] sm:$0xff]   ;;  %v336_v25 = vld [vmem:[%s1935_s24 + $0x30] sm:$0xff]  }
  0x8e   : > { %633 = vadd.xlane.f32.xlu1 %v615_v8  ;;  %629 = vadd.xlane.f32.xlu0 %v613_v9  ;;  %v622_v22 = vunpack.c.h.bf16 %v332_v6  ;;  %v621_v23 = vunpack.c.l.bf16 %v332_v6  ;;  %v624_v26 = vunpack.c.h.bf16 %v334_v24  ;;  %v623_v27 = vunpack.c.l.bf16 %v334_v24  ;;  %v338_v28 = vld [vmem:[%s1935_s24 + $0x38] sm:$0xff]   ;;  %v599_v33 = vld [vmem:[#allocation3 + $0x10] sm:$0xff]  ;;  %v597_v34 = vld [vmem:[#allocation3] sm:$0xff] }
  0x8f   : > { %1185 = vmatpush3.bf16.msra.mxu0 %v1374_v2  ;;  %1223 = vmatpush3.bf16.msra.mxu1 %v1374_v2  ;;  %v626_v29 = vunpack.c.h.bf16 %v336_v25  ;;  %v625_v30 = vunpack.c.l.bf16 %v336_v25  ;;  %v628_v31 = vunpack.c.h.bf16 %v338_v28  ;;  %v627_v32 = vunpack.c.l.bf16 %v338_v28  ;;  %v600_v39 = vld [vmem:[#allocation3 + $0x18] sm:$0xff]  ;;  %v598_v40 = vld [vmem:[#allocation3 + $0x8] sm:$0xff]  ;;  %v601_v46 = vld [vmem:[#allocation3 + $0x20] sm:$0xff] }
  0x90   : > { %1186 = vmatprep.subr.bf16.mxu0 %v1375_v3  ;;  %1216 = vmatprep.subr.bf16.mxu1 %v1375_v3  ;;  %v602_v45 = vld [vmem:[#allocation3 + $0x28] sm:$0xff]  ;;  %v604_v51 = vld [vmem:[#allocation3 + $0x38] sm:$0xff]  ;;  %v603_v52 = vld [vmem:[#allocation3 + $0x30] sm:$0xff] }
  0x91   : > { %v606_v57 = vld [vmem:[#allocation3 + $0x48] sm:$0xff]  ;;  %v605_v58 = vld [vmem:[#allocation3 + $0x40] sm:$0xff]  ;;  %v608_v63 = vld [vmem:[#allocation3 + $0x58] sm:$0xff] }
  0x92   : > { %635 = vadd.xlane.f32.xlu1 %v616_v11  ;;  %631 = vadd.xlane.f32.xlu0 %v614_v12  ;;  %v607_v0 = vld [vmem:[#allocation3 + $0x50] sm:$0xff]  ;;  %v610_v5 = vld [vmem:[#allocation3 + $0x68] sm:$0xff]  ;;  %v609_v6 = vld [vmem:[#allocation3 + $0x60] sm:$0xff] }
  0x93   : > { %1187 = vmatpush3.bf16.msra.mxu0 %v1375_v3  ;;  %1224 = vmatpush3.bf16.msra.mxu1 %v1375_v3  ;;  %v612_v11 = vld [vmem:[#allocation3 + $0x78] sm:$0xff]  ;;  %v611_v12 = vld [vmem:[#allocation3 + $0x70] sm:$0xff] }
  0x94   : > { %1188 = vmatprep.subr.bf16.mxu0 %v1376_v4  ;;  %1217 = vmatprep.subr.bf16.mxu1 %v1376_v4 }
  0x96   : > { %639 = vadd.xlane.f32.xlu1 %v618_v15  ;;  %637 = vadd.xlane.f32.xlu0 %v617_v16 }
  0x97   : > { %1189 = vmatpush3.bf16.msra.mxu0 %v1376_v4  ;;  %1225 = vmatpush3.bf16.msra.mxu1 %v1376_v4 }
  0x98   : > { %1190 = vmatprep.subr.bf16.mxu0 %v1377_v10  ;;  %1218 = vmatprep.subr.bf16.mxu1 %v1377_v10 }
  0x9a   : > { %643 = vadd.xlane.f32.xlu1 %v620_v19  ;;  %641 = vadd.xlane.f32.xlu0 %v619_v20 }
  0x9b   : > { %1191 = vmatpush3.bf16.msra.mxu0 %v1377_v10  ;;  %1226 = vmatpush3.bf16.msra.mxu1 %v1377_v10 }
  0x9c   : > { %1192 = vmatprep.subr.bf16.mxu0 %v1378_v13  ;;  %1219 = vmatprep.subr.bf16.mxu1 %v1378_v13 }
  0x9e   : > { %647 = vadd.xlane.f32.xlu1 %v622_v22  ;;  %645 = vadd.xlane.f32.xlu0 %v621_v23  ;;  %v340_v22 = vld [vmem:[#allocation2 + $0x30] sm:$0xff] }
  0x9f   : > { %1193 = vmatpush3.bf16.msra.mxu0 %v1378_v13  ;;  %1227 = vmatpush3.bf16.msra.mxu1 %v1378_v13 }
  0xa0   : > { %1194 = vmatprep.subr.bf16.mxu0 %v1379_v17  ;;  %1220 = vmatprep.subr.bf16.mxu1 %v1379_v17 }
  0xa2   : > { %651 = vadd.xlane.f32.xlu1 %v624_v26  ;;  %649 = vadd.xlane.f32.xlu0 %v623_v27  ;;  %v343_v27 = vld [vmem:[#allocation2 + $0x18] sm:$0xff] }
  0xa3   : > { %1195 = vmatpush3.bf16.msra.mxu0 %v1379_v17  ;;  %1228 = vmatpush3.bf16.msra.mxu1 %v1379_v17  ;;  %v342_v17 = vld [vmem:[#allocation2 + $0x58] sm:$0xff] }
  0xa4   : > { %1196 = vmatprep.subr.bf16.mxu0 %v1380_v21  ;;  %1221 = vmatprep.subr.bf16.mxu1 %v1380_v21 }
  0xa6   : > { %655 = vadd.xlane.f32.xlu1 %v626_v29  ;;  %653 = vadd.xlane.f32.xlu0 %v625_v30 }
  0xa7   : > { %1197 = vmatpush3.bf16.msra.mxu0 %v1380_v21  ;;  %1229 = vmatpush3.bf16.msra.mxu1 %v1380_v21  ;;  %v348_v21 = vld [vmem:[#allocation2 + $0x40] sm:$0xff] }
  0xaa   : > { %1199 = vmatmul.mubr.bf16.vlgmr.msra.gmra.mxu0 %v326_v7  ;;  %1207 = vmatmul.mubr.bf16.vlgmr.msra.gmra.mxu1 %v334_v24 }
  0xab   : > { %1202 = vmatprep.mubr.bf16.mxu0 %v328_v14  ;;  %1210 = vmatprep.mubr.bf16.mxu1 %v336_v25 }
  0xac   : > { %659 = vadd.xlane.f32.xlu1 %v628_v31  ;;  %657 = vadd.xlane.f32.xlu0 %v627_v32 }
  0xb2   : > { %1203 = vmatmul.mubr.bf16.gmra.mxu0 %v330_v18  ;;  %1211 = vmatmul.mubr.bf16.gmra.mxu1 %v338_v28  ;;  %v350_v18 = vld [vmem:[#allocation2 + $0x10] sm:$0xff]  ;;  %v351_v28 = vld [vmem:[#allocation2 + $0x38] sm:$0xff] }
 0x117   : > { %v634_v35 = vpop.xlane.xlu1 %633  ;;  %v630_v36 = vpop.xlane.xlu0 %629 }
 0x118   : > { %v663_v37 = vadd.f32 %v634_v35, %v599_v33  ;;  %v661_v38 = vadd.f32 %v630_v36, %v597_v34  ;;  %v349_v33 = vld [vmem:[#allocation2 + $0x20] sm:$0xff] }
 0x119   : > { %v341_v34 = vld [vmem:[#allocation2] sm:$0xff] }
 0x11a   : > { %680 = vst.msk [vmem:[#allocation3 + $0x10] sm:$0xff] %vm677_vm1, %v663_v37  ;;  %678 = vst.msk [vmem:[#allocation3] sm:$0xff] %vm677_vm1, %v661_v38 }
 0x11b   : > { %v636_v41 = vpop.xlane.xlu1 %635  ;;  %v632_v42 = vpop.xlane.xlu0 %631 }
 0x11c   : > { %v664_v43 = vadd.f32 %v636_v41, %v600_v39  ;;  %v662_v44 = vadd.f32 %v632_v42, %v598_v40  ;;  %v346_v39 = vld [vmem:[#allocation2 + $0x8] sm:$0xff]  ;;  %v354_v40 = vld [vmem:[#allocation2 + $0x78] sm:$0xff] }
 0x11e   : > { %681 = vst.msk [vmem:[#allocation3 + $0x18] sm:$0xff] %vm677_vm1, %v664_v43  ;;  %679 = vst.msk [vmem:[#allocation3 + $0x8] sm:$0xff] %vm677_vm1, %v662_v44 }
 0x11f   : > { %v640_v47 = vpop.xlane.xlu1 %639  ;;  %v638_v48 = vpop.xlane.xlu0 %637 }
 0x120   : > { %v666_v49 = vadd.f32 %v640_v47, %v602_v45  ;;  %v665_v50 = vadd.f32 %v638_v48, %v601_v46  ;;  %v352_v45 = vld [vmem:[#allocation2 + $0x60] sm:$0xff]  ;;  %v344_v46 = vld [vmem:[#allocation2 + $0x50] sm:$0xff] }
 0x122   : > { %683 = vst.msk [vmem:[#allocation3 + $0x28] sm:$0xff] %vm677_vm1, %v666_v49  ;;  %682 = vst.msk [vmem:[#allocation3 + $0x20] sm:$0xff] %vm677_vm1, %v665_v50 }
 0x123   : > { %v644_v53 = vpop.xlane.xlu1 %643  ;;  %v642_v54 = vpop.xlane.xlu0 %641 }
 0x124   : > { %v668_v55 = vadd.f32 %v644_v53, %v604_v51  ;;  %v667_v56 = vadd.f32 %v642_v54, %v603_v52  ;;  %v347_v51 = vld [vmem:[#allocation2 + $0x48] sm:$0xff] }
 0x125   : > { %v355_v52 = vld [vmem:[#allocation2 + $0x28] sm:$0xff] }
 0x126   : > { %685 = vst.msk [vmem:[#allocation3 + $0x38] sm:$0xff] %vm677_vm1, %v668_v55  ;;  %684 = vst.msk [vmem:[#allocation3 + $0x30] sm:$0xff] %vm677_vm1, %v667_v56 }
 0x127   : > { %v648_v59 = vpop.xlane.xlu1 %647  ;;  %v646_v60 = vpop.xlane.xlu0 %645 }
 0x128   : > { %v670_v61 = vadd.f32 %v648_v59, %v606_v57  ;;  %v669_v62 = vadd.f32 %v646_v60, %v605_v58  ;;  %v353_v57 = vld [vmem:[#allocation2 + $0x70] sm:$0xff]  ;;  %v345_v58 = vld [vmem:[#allocation2 + $0x68] sm:$0xff] }
 0x12a   : > { %687 = vst.msk [vmem:[#allocation3 + $0x48] sm:$0xff] %vm677_vm1, %v670_v61  ;;  %686 = vst.msk [vmem:[#allocation3 + $0x40] sm:$0xff] %vm677_vm1, %v669_v62 }
 0x12b   : > { %v652_v1 = vpop.xlane.xlu1 %651  ;;  %v650_v2 = vpop.xlane.xlu0 %649 }
 0x12c   : > { %v672_v3 = vadd.f32 %v652_v1, %v608_v63  ;;  %v671_v4 = vadd.f32 %v650_v2, %v607_v0 }
 0x12e   : > { %689 = vst.msk [vmem:[#allocation3 + $0x58] sm:$0xff] %vm677_vm1, %v672_v3  ;;  %688 = vst.msk [vmem:[#allocation3 + $0x50] sm:$0xff] %vm677_vm1, %v671_v4 }
 0x12f   : > { %v656_v7 = vpop.xlane.xlu1 %655  ;;  %v654_v8 = vpop.xlane.xlu0 %653 }
 0x130   : > { %v674_v9 = vadd.f32 %v656_v7, %v610_v5  ;;  %v673_v10 = vadd.f32 %v654_v8, %v609_v6 }
 0x132   : > { %691 = vst.msk [vmem:[#allocation3 + $0x68] sm:$0xff] %vm677_vm1, %v674_v9  ;;  %690 = vst.msk [vmem:[#allocation3 + $0x60] sm:$0xff] %vm677_vm1, %v673_v10 }
 0x135   : > { %v660_v13 = vpop.xlane.xlu1 %659  ;;  %v658_v14 = vpop.xlane.xlu0 %657 }
 0x136   : > { %v676_v15 = vadd.f32 %v660_v13, %v612_v11  ;;  %v675_v16 = vadd.f32 %v658_v14, %v611_v12 }
 0x138   : > { %693 = vst.msk [vmem:[#allocation3 + $0x78] sm:$0xff] %vm677_vm1, %v676_v15  ;;  %692 = vst.msk [vmem:[#allocation3 + $0x70] sm:$0xff] %vm677_vm1, %v675_v16 }
 0x16a   : > { %v1200_v19 = vpop.f32.mrf.mxu0  ;;  %v1208_v20 = vpop.f32.mrf.mxu1 }
 0x16b   : > { %v567_v23 = vadd.f32 %v1200_v19, %v342_v17  ;;  %v575_v24 = vadd.f32 %v1208_v20, %v350_v18 }
 0x16c   : > { %v534_v25 = vpop.f32.mrf.mxu1  ;;  %v502_v26 = vpop.f32.mrf.mxu0 }
 0x16d   : > { %583 = vst [vmem:[#allocation2 + $0x58] sm:$0xff] %v567_v23  ;;  %591 = vst [vmem:[#allocation2 + $0x10] sm:$0xff] %v575_v24  ;;  %v573_v29 = vadd.f32 %v534_v25, %v348_v21  ;;  %v565_v30 = vadd.f32 %v502_v26, %v340_v22 }
 0x16e   : > { %v1201_v31 = vpop.f32.mrf.mxu0  ;;  %v1209_v32 = vpop.f32.mrf.mxu1 }
 0x16f   : > { %589 = vst [vmem:[#allocation2 + $0x40] sm:$0xff] %v573_v29  ;;  %581 = vst [vmem:[#allocation2 + $0x30] sm:$0xff] %v565_v30  ;;  %v568_v35 = vadd.f32 %v1201_v31, %v343_v27  ;;  %v576_v36 = vadd.f32 %v1209_v32, %v351_v28 }
 0x170   : > { %v537_v37 = vpop.f32.mrf.mxu1  ;;  %v505_v38 = vpop.f32.mrf.mxu0 }
 0x171   : > { %584 = vst [vmem:[#allocation2 + $0x18] sm:$0xff] %v568_v35  ;;  %592 = vst [vmem:[#allocation2 + $0x38] sm:$0xff] %v576_v36  ;;  %v574_v41 = vadd.f32 %v537_v37, %v349_v33  ;;  %v566_v42 = vadd.f32 %v505_v38, %v341_v34 }
 0x172   : > { %v1204_v43 = vpop.f32.mrf.mxu0  ;;  %v1212_v44 = vpop.f32.mrf.mxu1 }
 0x173   : > { %590 = vst [vmem:[#allocation2 + $0x20] sm:$0xff] %v574_v41  ;;  %582 = vst [vmem:[#allocation2] sm:$0xff] %v566_v42  ;;  %v571_v47 = vadd.f32 %v1204_v43, %v346_v39  ;;  %v579_v48 = vadd.f32 %v1212_v44, %v354_v40 }
 0x174   : > { %v550_v49 = vpop.f32.mrf.mxu1  ;;  %v518_v50 = vpop.f32.mrf.mxu0 }
 0x175   : > { %587 = vst [vmem:[#allocation2 + $0x8] sm:$0xff] %v571_v47  ;;  %595 = vst [vmem:[#allocation2 + $0x78] sm:$0xff] %v579_v48  ;;  %v577_v53 = vadd.f32 %v550_v49, %v352_v45  ;;  %v569_v54 = vadd.f32 %v518_v50, %v344_v46 }
 0x176   : > { %v1205_v55 = vpop.f32.mrf.mxu0  ;;  %v1213_v56 = vpop.f32.mrf.mxu1 }
 0x177   : > { %593 = vst [vmem:[#allocation2 + $0x60] sm:$0xff] %v577_v53  ;;  %585 = vst [vmem:[#allocation2 + $0x50] sm:$0xff] %v569_v54  ;;  %v572_v59 = vadd.f32 %v1205_v55, %v347_v51  ;;  %v580_v60 = vadd.f32 %v1213_v56, %v355_v52  ;;  %697 = sbr.rel (%p1117_p8) target bundleno = 554 (0x22a), region = 52 }
 0x178   : > { %v553_v61 = vpop.f32.mrf.mxu1  ;;  %v521_v62 = vpop.f32.mrf.mxu0 }
 0x179   : > { %588 = vst [vmem:[#allocation2 + $0x48] sm:$0xff] %v572_v59  ;;  %596 = vst [vmem:[#allocation2 + $0x28] sm:$0xff] %v580_v60  ;;  %v578_v63 = vadd.f32 %v553_v61, %v353_v57  ;;  %v570_v0 = vadd.f32 %v521_v62, %v345_v58 }
 0x17b   : > { %594 = vst [vmem:[#allocation2 + $0x70] sm:$0xff] %v578_v63  ;;  %586 = vst [vmem:[#allocation2 + $0x68] sm:$0xff] %v570_v0 }
 0x17c   : > { %v700_v1 = vld [vmem:[#allocation3 + $0x10] sm:$0xff]  ;;  %v698_v2 = vld [vmem:[#allocation3] sm:$0xff]  ;;  %v701_v3 = vld [vmem:[#allocation3 + $0x18] sm:$0xff]  ;;  %v1676_v4 = vmov 0  }
 0x17d   : > { %1398 = vset.pattern.permute.xlu1 %v1676_v4  ;;  %1397 = vset.pattern.permute.xlu0 %v1676_v4  ;;  %1399 = vrcp.f32 %v700_v1  ;;  %v699_v5 = vld [vmem:[#allocation3 + $0x8] sm:$0xff]  ;;  %v702_v7 = vld [vmem:[#allocation3 + $0x20] sm:$0xff]  ;;  %v705_v8 = vld [vmem:[#allocation3 + $0x38] sm:$0xff]  ;;  %vm716_vm2 = vcmp.gt.f32.partialorder %v700_v1, 0.0  ;;  %vm714_vm3 = vcmp.gt.f32.partialorder %v698_v2, 0.0  ;;  %vm717_vm4 = vcmp.gt.f32.partialorder %v701_v3, 0.0 }
 0x17e   : > { %1401 = vrcp.f32 %v698_v2  ;;  %v703_v6 = vld [vmem:[#allocation3 + $0x28] sm:$0xff]  ;;  %v704_v9 = vld [vmem:[#allocation3 + $0x30] sm:$0xff]  ;;  %v706_v11 = vld [vmem:[#allocation3 + $0x40] sm:$0xff]  ;;  %vm715_vm5 = vcmp.gt.f32.partialorder %v699_v5, 0.0  ;;  %vm718_vm7 = vcmp.gt.f32.partialorder %v702_v7, 0.0  ;;  %vm721_vm8 = vcmp.gt.f32.partialorder %v705_v8, 0.0 }
 0x17f   : > { %1403 = vrcp.f32 %v701_v3  ;;  %v707_v10 = vld [vmem:[#allocation3 + $0x48] sm:$0xff]  ;;  %v709_v13 = vld [vmem:[#allocation3 + $0x58] sm:$0xff]  ;;  %v708_v16 = vld [vmem:[#allocation3 + $0x50] sm:$0xff]  ;;  %vm719_vm6 = vcmp.gt.f32.partialorder %v703_v6, 0.0  ;;  %vm720_vm9 = vcmp.gt.f32.partialorder %v704_v9, 0.0  ;;  %vm722_vm11 = vcmp.gt.f32.partialorder %v706_v11, 0.0 }
 0x180   : > { %1405 = vrcp.f32 %v699_v5  ;;  %v711_v23 = vld [vmem:[#allocation3 + $0x68] sm:$0xff]  ;;  %v710_v25 = vld [vmem:[#allocation3 + $0x60] sm:$0xff]  ;;  %v713_v29 = vld [vmem:[#allocation3 + $0x78] sm:$0xff]  ;;  %vm723_vm10 = vcmp.gt.f32.partialorder %v707_v10, 0.0  ;;  %vm725_vm12 = vcmp.gt.f32.partialorder %v709_v13, 0.0  ;;  %vm724_vm13 = vcmp.gt.f32.partialorder %v708_v16, 0.0 }
 0x181   : > { %1407 = vrcp.f32 %v703_v6  ;;  %v712_v31 = vld [vmem:[#allocation3 + $0x70] sm:$0xff]  ;;  %vm727_vm14 = vcmp.gt.f32.partialorder %v711_v23, 0.0  ;;  %vm726_vm15 = vcmp.gt.f32.partialorder %v710_v25, 0.0  ;;  %vm729_vm0 = vcmp.gt.f32.partialorder %v713_v29, 0.0  ;;  %v1159_v50 = vld [vmem:[%s1953_s10 + $0x8] sm:$0xff]   ;;  %v1128_v51 = vld [vmem:[%s1953_s10] sm:$0xff]  }
 0x182   : > { %1409 = vrcp.f32 %v702_v7  ;;  %vm728_vm1 = vcmp.gt.f32.partialorder %v712_v31, 0.0  ;;  %v764_v52 = vld [vmem:[#allocation2 + $0x58] sm:$0xff]  ;;  %v1133_v53 = vunpack.c.l.bf16 %v1159_v50  ;;  %v762_v54 = vld [vmem:[#allocation2 + $0x30] sm:$0xff]  ;;  %v1129_v56 = vunpack.c.l.bf16 %v1128_v51  ;;  %v763_v63 = vld [vmem:[#allocation2] sm:$0xff] }
 0x183   : > { %1411 = vrcp.f32 %v705_v8  ;;  %v765_v60 = vld [vmem:[#allocation2 + $0x18] sm:$0xff]  ;;  %v1134_v62 = vunpack.c.h.bf16 %v1159_v50  ;;  %v1130_v2 = vunpack.c.h.bf16 %v1128_v51  ;;  %v1160_v3 = vld [vmem:[%s1953_s10 + $0x10] sm:$0xff]   ;;  %v767_v7 = vld [vmem:[#allocation2 + $0x68] sm:$0xff] }
 0x184   : > { %1413 = vrcp.f32 %v704_v9  ;;  %v1138_v9 = vunpack.c.h.bf16 %v1160_v3  ;;  %v775_v51 = vld [vmem:[#allocation2 + $0x70] sm:$0xff] }
 0x185   : > { %1415 = vrcp.f32 %v707_v10  ;;  %v766_v10 = vld [vmem:[#allocation2 + $0x50] sm:$0xff] }
 0x186   : > { %1417 = vrcp.f32 %v706_v11 }
 0x187   : > { %1419 = vrcp.f32 %v709_v13  ;;  %v1137_v13 = vunpack.c.l.bf16 %v1160_v3 }
 0x188   : > { %1421 = vrcp.f32 %v708_v16 }
 0x189   : > { %1423 = vrcp.f32 %v711_v23 }
 0x18a   : > { %v1400_v12 = vpop.eup %1399  ;;  %1425 = vrcp.f32 %v710_v25  ;;  %v1162_v25 = vld [vmem:[%s1953_s10 + $0x20] sm:$0xff]  }
 0x18b   : > { %v1402_v14 = vpop.eup %1401  ;;  %v748_v15 = vsel %vm716_vm2, %v1400_v12, 0.0  ;;  %1427 = vrcp.f32 %v713_v29  ;;  %v771_v29 = vld [vmem:[#allocation2 + $0x20] sm:$0xff] }
 0x18c   : > { %v1404_v17 = vpop.eup %1403  ;;  %790 = vperm.xlu1 %1398, %v748_v15   ;;  %v746_v18 = vsel %vm714_vm3, %v1402_v14, 0.0  ;;  %1429 = vrcp.f32 %v712_v31  ;;  %v1161_v14 = vld [vmem:[%s1953_s10 + $0x18] sm:$0xff]   ;;  %v1146_v31 = vunpack.c.h.bf16 %v1162_v25 }
 0x18d   : > { %v1406_v19 = vpop.eup %1405  ;;  %780 = vperm.xlu0 %1397, %v746_v18   ;;  %v749_v20 = vsel %vm717_vm4, %v1404_v17, 0.0  ;;  %v769_v18 = vld [vmem:[#allocation2 + $0x48] sm:$0xff] }
 0x18e   : > { %v1408_v21 = vpop.eup %1407  ;;  %v747_v22 = vsel %vm715_vm5, %v1406_v19, 0.0 }
 0x18f   : > { %v1410_v24 = vpop.eup %1409  ;;  %v751_v26 = vsel %vm719_vm6, %v1408_v21, 0.0  ;;  %v768_v21 = vld [vmem:[#allocation2 + $0x8] sm:$0xff] }
 0x190   : > { %795 = vperm.xlu1 %1398, %v749_v20   ;;  %v1412_v27 = vpop.eup %1411  ;;  %v750_v28 = vsel %vm718_vm7, %v1410_v24, 0.0  ;;  %v1142_v20 = vunpack.c.h.bf16 %v1161_v14  ;;  %v1141_v24 = vunpack.c.l.bf16 %v1161_v14 }
 0x191   : > { %785 = vperm.xlu0 %1397, %v747_v22   ;;  %v1414_v30 = vpop.eup %1413  ;;  %v753_v32 = vsel %vm721_vm8, %v1412_v27, 0.0 }
 0x192   : > { %v1416_v33 = vpop.eup %1415  ;;  %v752_v34 = vsel %vm720_vm9, %v1414_v30, 0.0 }
 0x193   : > { %v1418_v35 = vpop.eup %1417  ;;  %v755_v36 = vsel %vm723_vm10, %v1416_v33, 0.0 }
 0x194   : > { %805 = vperm.xlu1 %1398, %v751_v26   ;;  %v1420_v37 = vpop.eup %1419  ;;  %v754_v38 = vsel %vm722_vm11, %v1418_v35, 0.0  ;;  %v1145_v35 = vunpack.c.l.bf16 %v1162_v25 }
 0x195   : > { %800 = vperm.xlu0 %1397, %v750_v28   ;;  %v1422_v39 = vpop.eup %1421  ;;  %v757_v40 = vsel %vm725_vm12, %v1420_v37, 0.0 }
 0x196   : > { %v1424_v41 = vpop.eup %1423  ;;  %v756_v42 = vsel %vm724_vm13, %v1422_v39, 0.0 }
 0x197   : > { %v1426_v43 = vpop.eup %1425  ;;  %v759_v44 = vsel %vm727_vm14, %v1424_v41, 0.0 }
 0x198   : > { %815 = vperm.xlu1 %1398, %v753_v32   ;;  %v1428_v45 = vpop.eup %1427  ;;  %v758_v46 = vsel %vm726_vm15, %v1426_v43, 0.0  ;;  %v770_v32 = vld [vmem:[#allocation2 + $0x40] sm:$0xff]  ;;  %v772_v43 = vld [vmem:[#allocation2 + $0x10] sm:$0xff] }
 0x199   : > { %810 = vperm.xlu0 %1397, %v752_v34   ;;  %v1430_v47 = vpop.eup %1429  ;;  %v761_v48 = vsel %vm729_vm0, %v1428_v45, 0.0 }
 0x19a   : > { %v760_v49 = vsel %vm728_vm1, %v1430_v47, 0.0  ;;  %v1164_v47 = vld [vmem:[%s1953_s10 + $0x30] sm:$0xff]  }
 0x19c   : > { %825 = vperm.xlu1 %1398, %v755_v36   ;;  %v1163_v36 = vld [vmem:[%s1953_s10 + $0x28] sm:$0xff]  }
 0x19d   : > { %820 = vperm.xlu0 %1397, %v754_v38  }
 0x1a0   : > { %835 = vperm.xlu1 %1398, %v757_v40   ;;  %v773_v40 = vld [vmem:[#allocation2 + $0x38] sm:$0xff] }
 0x1a1   : > { %830 = vperm.xlu0 %1397, %v756_v42   ;;  %v1150_v42 = vunpack.c.h.bf16 %v1163_v36 }
 0x1a4   : > { %845 = vperm.xlu1 %1398, %v759_v44  }
 0x1a5   : > { %840 = vperm.xlu0 %1397, %v758_v46   ;;  %v1149_v46 = vunpack.c.l.bf16 %v1163_v36 }
 0x1a8   : > { %855 = vperm.xlu1 %1398, %v761_v48  }
 0x1a9   : > { %850 = vperm.xlu0 %1397, %v760_v49  }
 0x207   : > { %v791_v55 = vpop.permute.xlu1 %790 }
 0x208   : > { %v860_v57 = vmul.f32 %v791_v55, %v764_v52  ;;  %v781_v58 = vpop.permute.xlu0 %780 }
 0x209   : > { %v858_v59 = vmul.f32 %v781_v58, %v762_v54  ;;  %v774_v54 = vld [vmem:[#allocation2 + $0x60] sm:$0xff]  ;;  %v1165_v58 = vld [vmem:[%s1953_s10 + $0x38] sm:$0xff]  }
 0x20a   : > { %v908_v61 = vadd.f32 %v1133_v53, %v860_v57  ;;  %v1154_v53 = vunpack.c.h.bf16 %v1164_v47  ;;  %v1153_v57 = vunpack.c.l.bf16 %v1164_v47 }
 0x20b   : > { %v906_v0 = vadd.f32 %v1129_v56, %v858_v59  ;;  %v796_v1 = vpop.permute.xlu1 %795 }
 0x20c   : > { %924 = vst [vmem:[%s1960_s20 + $0x10] sm:$0xff] %v908_v61  ;;  %v861_v4 = vmul.f32 %v796_v1, %v765_v60  ;;  %v786_v5 = vpop.permute.xlu0 %785  ;;  %v776_v1 = vld [vmem:[#allocation2 + $0x78] sm:$0xff] }
 0x20d   : > { %922 = vst [vmem:[%s1960_s20] sm:$0xff] %v906_v0  ;;  %v859_v6 = vmul.f32 %v786_v5, %v763_v63  ;;  %v1158_v0 = vunpack.c.h.bf16 %v1165_v58 }
 0x20e   : > { %v909_v8 = vadd.f32 %v1134_v62, %v861_v4  ;;  %v777_v62 = vld [vmem:[#allocation2 + $0x28] sm:$0xff]  ;;  %v1157_v4 = vunpack.c.l.bf16 %v1165_v58 }
 0x20f   : > { %v907_v11 = vadd.f32 %v1130_v2, %v859_v6  ;;  %v806_v12 = vpop.permute.xlu1 %805 }
 0x210   : > { %925 = vst [vmem:[%s1960_s20 + $0x18] sm:$0xff] %v909_v8  ;;  %v863_v15 = vmul.f32 %v806_v12, %v767_v7  ;;  %v801_v16 = vpop.permute.xlu0 %800 }
 0x211   : > { %923 = vst [vmem:[%s1960_s20 + $0x8] sm:$0xff] %v907_v11  ;;  %v862_v17 = vmul.f32 %v801_v16, %v766_v10 }
 0x212   : > { %v911_v19 = vadd.f32 %v1138_v9, %v863_v15 }
 0x213   : > { %v910_v22 = vadd.f32 %v1137_v13, %v862_v17  ;;  %v816_v23 = vpop.permute.xlu1 %815 }
 0x214   : > { %927 = vst [vmem:[%s1960_s20 + $0x28] sm:$0xff] %v911_v19  ;;  %v865_v26 = vmul.f32 %v816_v23, %v769_v18  ;;  %v811_v27 = vpop.permute.xlu0 %810 }
 0x215   : > { %926 = vst [vmem:[%s1960_s20 + $0x20] sm:$0xff] %v910_v22  ;;  %v864_v28 = vmul.f32 %v811_v27, %v768_v21 }
 0x216   : > { %v913_v30 = vadd.f32 %v1142_v20, %v865_v26 }
 0x217   : > { %v912_v33 = vadd.f32 %v1141_v24, %v864_v28  ;;  %v826_v34 = vpop.permute.xlu1 %825 }
 0x218   : > { %929 = vst [vmem:[%s1960_s20 + $0x38] sm:$0xff] %v913_v30  ;;  %v867_v37 = vmul.f32 %v826_v34, %v771_v29  ;;  %v821_v38 = vpop.permute.xlu0 %820 }
 0x219   : > { %928 = vst [vmem:[%s1960_s20 + $0x30] sm:$0xff] %v912_v33  ;;  %v866_v39 = vmul.f32 %v821_v38, %v770_v32 }
 0x21a   : > { %v915_v41 = vadd.f32 %v1146_v31, %v867_v37 }
 0x21b   : > { %v914_v44 = vadd.f32 %v1145_v35, %v866_v39  ;;  %v836_v45 = vpop.permute.xlu1 %835 }
 0x21c   : > { %931 = vst [vmem:[%s1960_s20 + $0x48] sm:$0xff] %v915_v41  ;;  %v869_v48 = vmul.f32 %v836_v45, %v773_v40  ;;  %v831_v49 = vpop.permute.xlu0 %830 }
 0x21d   : > { %930 = vst [vmem:[%s1960_s20 + $0x40] sm:$0xff] %v914_v44  ;;  %v868_v50 = vmul.f32 %v831_v49, %v772_v43 }
 0x21e   : > { %v917_v52 = vadd.f32 %v1150_v42, %v869_v48 }
 0x21f   : > { %v916_v55 = vadd.f32 %v1149_v46, %v868_v50  ;;  %v846_v56 = vpop.permute.xlu1 %845 }
 0x220   : > { %933 = vst [vmem:[%s1960_s20 + $0x58] sm:$0xff] %v917_v52  ;;  %v871_v59 = vmul.f32 %v846_v56, %v775_v51  ;;  %v841_v60 = vpop.permute.xlu0 %840 }
 0x221   : > { %932 = vst [vmem:[%s1960_s20 + $0x50] sm:$0xff] %v916_v55  ;;  %v870_v61 = vmul.f32 %v841_v60, %v774_v54 }
 0x222   : > { %v919_v63 = vadd.f32 %v1154_v53, %v871_v59 }
 0x223   : > { %v918_v2 = vadd.f32 %v1153_v57, %v870_v61  ;;  %v856_v3 = vpop.permute.xlu1 %855 }
 0x224   : > { %935 = vst [vmem:[%s1960_s20 + $0x68] sm:$0xff] %v919_v63  ;;  %v873_v5 = vmul.f32 %v856_v3, %v777_v62  ;;  %v851_v6 = vpop.permute.xlu0 %850 }
 0x225   : > { %934 = vst [vmem:[%s1960_s20 + $0x60] sm:$0xff] %v918_v2  ;;  %v872_v7 = vmul.f32 %v851_v6, %v776_v1 }
 0x226   : > { %v921_v8 = vadd.f32 %v1158_v0, %v873_v5 }
 0x227   : > { %v920_v9 = vadd.f32 %v1157_v4, %v872_v7 }
 0x228   : > { %937 = vst [vmem:[%s1960_s20 + $0x78] sm:$0xff] %v921_v8 }
 0x229   : > { %936 = vst [vmem:[%s1960_s20 + $0x70] sm:$0xff] %v920_v9 }
 0x22a PF: > { %s2169_s21 = sld [smem:[#allocation16_spill]]  ;;  %s952_s11 = sshll.u32 %s1960_s20, 4  ;;  %s2043_s11 = int_to_ptr.vmem [resolvable:$true] %s952_s11 }
 0x22b   : > { %s2170_s5 = sld [smem:[#allocation25_spill]]  ;;  %s939_s29 = scalar_lea.sflag [#allocation6], %s1950_s7 }
 0x22c   : > { %s1515_s15 = scalar_lea.vmem %s2043_s11, 2048  ;;  %s1677_s24 = smov [#allocation10]  }
 0x22d   : > { %p1516_p5 = scmp.ne.s32.totalorder %s2043_s11, %s1515_s15  ;;  %s1519_s23 = sshll.u32 %s1677_s24, 4  ;;  %s1520_s23 = int_to_ptr.vmem [resolvable:$false] %s1519_s23 }
 0x22e   : > { %s1521_s0 = scalar_lea.vmem %s1520_s23, 4096  ;;  %p1522_p6 = scmp.lt.s32.totalorder %s2043_s11, %s1520_s23 }
 0x22f   : > { %p1517_p3 = pnand %p1516_p5, %p1905_p4  ;;  %p1523_p11 = scmp.lt.s32.totalorder %s1521_s0, %s1515_s15 }
 0x230   : > { %s1126_s8 = sshll.u32 %s2169_s21, 11 }
 0x231   : > { %s2040_s28 = scalar_lea.hbm %s2170_s5, %s1126_s8  ;;  %p1518_p12 = pneg %p1517_p3 }
 0x232   : > { %p1524_p9 = por %p1523_p11, %p1522_p6 }
 0x234   : > { %p1525_p13 = pnand %p1524_p9, %p1518_p12 }
 0x236   : > { %1528 = shalt.err (!%p1525_p13)
}
 0x237   : > { %s1529_s22 = scalar_lea.hbm %s2040_s28, 2048  ;;  %s1533_s3 = scalar_lea.hbm %s2170_s5, 4096 }
 0x238   : > { %p1530_p0 = scmp.ne.s32.totalorder %s2040_s28, %s1529_s22  ;;  %p1534_p1 = scmp.lt.s32.totalorder %s2040_s28, %s2170_s5 }
 0x239   : > { %p1535_p2 = scmp.lt.s32.totalorder %s1533_s3, %s1529_s22 }
 0x23a   : > { %p1531_p10 = pnand %p1530_p0, %p1905_p4 }
 0x23b   : > { %p1536_p8 = por %p1535_p2, %p1534_p1 }
 0x23c   : > { %p1532_p7 = pneg %p1531_p10 }
 0x23e   : > { %p1537_p5 = pnand %p1536_p8, %p1532_p7 }
 0x240   : > { %1540 = shalt.err (!%p1537_p5)
}
 0x241   : > { %s1678_s20 = smov 128   ;;  %s1679_s21 = smov 8  }
 0x242   : > { %1236 = dma.vmem_to_hbm [thread:$0]  (%p1905_p4), %s2043_s11, 2048, %s2040_s28, %s939_s29, %s1678_s20, %s1678_s20, %s1679_s21  }
 0x243 PF: > { %p1253_p3 = scmp.ge.s32.totalorder %s1667_s25, 2  ;;  %s967_s8 = sand.u32 1, %s1615_s12  }
 0x244   : > { %p2171_p12 = scmp.ne.s32.totalorder %s2166_s1, 0  ;;  %s968_s18 = scalar_lea.sflag [#allocation6], %s967_s8 }
 0x246   : > { %p1249_p6 = pnand %p1253_p3, %p2171_p12 }
 0x248   : > { %p1250_p11 = pneg %p1249_p6 }
 0x24a   : > { %1610 = dma.done.wait (%p1250_p11), %s968_s18, 2048  }
 0x24b   : > { %1612 = vsyncadd (%p1250_p11), %s968_s18, 4294965248  ;;  %s22_s25 = sadd.s32 1, %s1667_s25   ;;  %s2173_s27 = sld [smem:[#allocation21_spill]] }
 0x24c   : > { %p2073_p9 = scmp.ge.s32.totalorder %s22_s25, 6   ;;  %s2174_s7 = sld [smem:[#allocation15_spill]] }
 0x24d   : > { %s2175_s20 = sld [smem:[#allocation22_spill]]  ;;  %s2180_s12 = smov %s1619_s13 }
 0x24e   : > { %s2176_s21 = sld [smem:[#allocation17_spill]]  ;;  %s2181_s13 = smov %s1623_s14 }
 0x24f   : > { %s2177_s22 = sld [smem:[#allocation18_spill]]  ;;  %s2182_s14 = smov %s1890_s9 }
 0x250   : > { %s2178_s23 = sld [smem:[#allocation19_spill]]  ;;  %s2183_s15 = smov %s1631_s16 }
 0x251   : > { %s2179_s24 = sld [smem:[#allocation20_spill]]  ;;  %s2184_s16 = smov %s1635_s17 }
 0x252   : > { %s2185_s17 = smov %s2173_s27  ;;  %s2186_s18 = smov %s1643_s19 }
 0x253   : > { %s2187_s19 = smov %s2174_s7  ;;  %21 = sbr.rel (!%p2073_p9) target bundleno = 16 (0x10), region = 109 }
 0x258   :  { %973 = vsyncpa [#allocation5], 1 }
 0x259   :  { %975 = vsyncpa [#allocation5 + $0x1], 1 }
 0x25a   :  { %976 = vsyncpa [#allocation8], 1 }
 0x25b   :  { %978 = vsyncpa [#allocation8 + $0x1], 1 }
 0x25c   :  { %979 = vsyncpa [#allocation6], 1 }
 0x25d   :  { %981 = vsyncpa [#allocation6 + $0x1], 1 }

</bundles_post_ra>
